<compile_context>
chip_gen: v7x
topology: tpu7x:2x2x1
jax: 0.10.0
libtpu: 0.0.40
codegen_flags: <defaults>
</compile_context>

<pallas_src>
import functools

import jax
import jax.numpy as jnp
from jax.experimental import pallas as pl
from jax.experimental.pallas import tpu as pltpu


def _log_sigmoid(x):
    # Stable log(sigmoid(x)) = min(x, 0) - log(1 + exp(-|x|)).
    return jnp.minimum(x, 0.0) - jnp.log(1.0 + jnp.exp(-jnp.abs(x)))


def _bpr_tile_kernel(pu_ref, qi_ref, qj_ref, out_ref, *, batch, tile):
    """One batch tile: partial sum of log_sigmoid(sum_d pu*(qi-qj)) over TB cols.

    Blocks are lane-dense (D, TB); the dot is a VPU multiply + sublane reduce.
    Each grid step writes its own partial-sum scalar (no carried state), so the
    grid axis is safely 'parallel'.
    """
    b = pl.program_id(0)

    pu = pu_ref[...]                                   # (D, TB)
    qd = qi_ref[...] - qj_ref[...]                     # fold: single reduce
    x = jnp.sum(pu * qd, axis=0, keepdims=True)        # (1, TB)
    ls = _log_sigmoid(x)

    @pl.when(b < pl.num_programs(0) - 1)
    def _():
        out_ref[0, 0] = jnp.sum(ls)

    @pl.when(b == pl.num_programs(0) - 1)
    def _():
        # Only the last tile can contain padded columns; mask them here.
        col = b * tile + jax.lax.broadcasted_iota(jnp.int32, ls.shape, 1)
        out_ref[0, 0] = jnp.sum(jnp.where(col < batch, ls, 0.0))


def _pick_tile(batch, dim, n_inputs):
    """Pick the batch-tile width TB (lane dimension, multiple of 128).

    VMEM per input block = round_up(dim, 8) * TB * 4 bytes (blocks are (D, TB),
    lane-dense, so only the sublane dim pads).  Budget ~24 MiB for
    n_inputs x 2 (double buffer) blocks -> fits v7x's 64 MiB VMEM with room.
    """
    d_pad = max(8, -(-dim // 8) * 8)
    budget = 24 * 1024 * 1024
    cap = budget // (n_inputs * 2 * d_pad * 4)
    cap = max(128, (cap // 128) * 128)
    cap = min(cap, 32768)                    # keep per-block DMA in the 2-8 MiB range
    need = -(-batch // 128) * 128            # no point tiling wider than the batch
    return min(cap, need)


def bpr_forward(P, Q, delta_P, delta_Q, u, i, j, mode):
    """Replicates BPR.forward(u, i, j, mode).  `mode` is a static Python int."""
    B = u.shape[0]
    D = P.shape[1]

    if mode == 1:
        # APR: fold the (non-trainable) adversarial perturbations into the
        # tables once; the streaming kernel then reuses the 3-input BPR path.
        P = P + delta_P
        Q = Q + delta_Q

    TB = _pick_tile(B, D, n_inputs=3)
    Bp = -(-B // TB) * TB
    G = Bp // TB

    # Lane-dense (D, B) gathers: transpose the (small) tables once and gather
    # columns so the kernel blocks are (D, TB) with TB a multiple of 128.
    Pt = P.T                                  # (D, user_size)
    Qt = Q.T                                  # (D, item_size)
    pu = jnp.take(Pt, u, axis=1)              # (D, B)
    qi = jnp.take(Qt, i, axis=1)
    qj = jnp.take(Qt, j, axis=1)

    if Bp != B:
        pad = ((0, 0), (0, Bp - B))
        pu = jnp.pad(pu, pad)
        qi = jnp.pad(qi, pad)
        qj = jnp.pad(qj, pad)

    row_spec = pl.BlockSpec((D, TB), lambda b: (0, b))
    out_spec = pl.BlockSpec((1, 1), lambda b: (b, 0),
                            memory_space=pltpu.MemorySpace.SMEM)

    partials = pl.pallas_call(
        functools.partial(_bpr_tile_kernel, batch=B, tile=TB),
        out_shape=jax.ShapeDtypeStruct((G, 1), jnp.float32),
        grid=(G,),
        in_specs=[row_spec, row_spec, row_spec],
        out_specs=out_spec,
        compiler_params=pltpu.CompilerParams(
            # No carried state -> batch axis is independent per tile; lets v7x
            # shard the grid across its two TensorCores (no-op on v5e/v6e).
            dimension_semantics=("parallel",),
            # 3 inputs x 2 buffers x (<=4 MiB) = <=24 MiB; 40 MiB leaves
            # headroom yet stays inside v7x's 64 MiB physical VMEM.
            vmem_limit_bytes=40 * 1024 * 1024,
        ),
    )(pu, qi, qj)

    return -jnp.sum(partials) / B


def _reference(P, Q, delta_P, delta_Q, u, i, j, mode):
    p_u = P[u]
    q_i = Q[i]
    q_j = Q[j]
    if mode == 1:
        p_u = p_u + delta_P[u]
        q_i = q_i + delta_Q[i]
        q_j = q_j + delta_Q[j]
    x_uij = jnp.sum(p_u * q_i, axis=1) - jnp.sum(p_u * q_j, axis=1)
    return -jnp.mean(jnp.log(jax.nn.sigmoid(x_uij)))


if __name__ == "__main__":
    user_size, item_size, dim, batch = 16, 24, 32, 8

    key = jax.random.PRNGKey(0)
    k_p, k_q, k_u, k_i, k_j, k_dp, k_dq = jax.random.split(key, 7)

    # Deterministic parameter init, matching nn.Parameter(torch.rand(...)) / zeros.
    P = jax.random.uniform(k_p, (user_size, dim), dtype=jnp.float32)
    Q = jax.random.uniform(k_q, (item_size, dim), dtype=jnp.float32)
    delta_P = jnp.zeros((user_size, dim), dtype=jnp.float32)
    delta_Q = jnp.zeros((item_size, dim), dtype=jnp.float32)

    u = jax.random.randint(k_u, (batch,), 0, user_size)
    i = jax.random.randint(k_i, (batch,), 0, item_size)
    j = jax.random.randint(k_j, (batch,), 0, item_size)

    # mode != 1 -> bpr_loss
    loss_bpr = bpr_forward(P, Q, delta_P, delta_Q, u, i, j, mode=0)
    jax.block_until_ready(loss_bpr)
    ref_bpr = _reference(P, Q, delta_P, delta_Q, u, i, j, mode=0)
    assert jnp.allclose(loss_bpr, ref_bpr, atol=1e-5, rtol=1e-5)

    # mode == 1 -> apr_loss (zero-initialized perturbations, as in the module)
    loss_apr = bpr_forward(P, Q, delta_P, delta_Q, u, i, j, mode=1)
    jax.block_until_ready(loss_apr)
    ref_apr = _reference(P, Q, delta_P, delta_Q, u, i, j, mode=1)
    assert jnp.allclose(loss_apr, ref_apr, atol=1e-5, rtol=1e-5)

    # apr_loss with non-zero perturbations (exercises the folded table adds)
    dP = 0.01 * jax.random.normal(k_dp, (user_size, dim), dtype=jnp.float32)
    dQ = 0.01 * jax.random.normal(k_dq, (item_size, dim), dtype=jnp.float32)
    loss_apr2 = bpr_forward(P, Q, dP, dQ, u, i, j, mode=1)
    jax.block_until_ready(loss_apr2)
    ref_apr2 = _reference(P, Q, dP, dQ, u, i, j, mode=1)
    assert jnp.allclose(loss_apr2, ref_apr2, atol=1e-5, rtol=1e-5)

    # Non-multiple-of-tile batch (exercises padding + last-tile mask)
    u13 = jax.random.randint(k_u, (13,), 0, user_size)
    i13 = jax.random.randint(k_i, (13,), 0, item_size)
    j13 = jax.random.randint(k_j, (13,), 0, item_size)
    loss13 = bpr_forward(P, Q, delta_P, delta_Q, u13, i13, j13, mode=0)
    jax.block_until_ready(loss13)
    ref13 = _reference(P, Q, delta_P, delta_Q, u13, i13, j13, mode=0)
    assert jnp.allclose(loss13, ref13, atol=1e-5, rtol=1e-5)

    print("KERNEL_OK")
</pallas_src>

<mosaic_0001>
module attributes {stable_mosaic.version = 11 : i64} {
  func.func @_bpr_tile_kernel(%arg0: i32, %arg1: memref<32x128xf32, #tpu.memory_space<vmem>>, %arg2: memref<32x128xf32, #tpu.memory_space<vmem>>, %arg3: memref<32x128xf32, #tpu.memory_space<vmem>>, %arg4: memref<1x1xf32, #tpu.memory_space<smem>>) attributes {dimension_semantics = [#tpu.dimension_semantics<parallel>], iteration_bounds = array<i64: 1>, scalar_prefetch = 0 : i64, scratch_operands = 0 : i64, tpu.core_type = #tpu.core_type<tc>, window_params = [{transform_indices = @transform_0, window_bounds = array<i64: 32, 128>}, {transform_indices = @transform_1, window_bounds = array<i64: 32, 128>}, {transform_indices = @transform_2, window_bounds = array<i64: 32, 128>}, {transform_indices = @transform_3, window_bounds = array<i64: 1, 1>}]} {
    %c0 = arith.constant 0 : index
    %c0_0 = arith.constant 0 : index
    %0 = vector.load %arg1[%c0, %c0_0] : memref<32x128xf32, #tpu.memory_space<vmem>>, vector<32x128xf32>
    %c0_1 = arith.constant 0 : index
    %c0_2 = arith.constant 0 : index
    %1 = vector.load %arg2[%c0_1, %c0_2] : memref<32x128xf32, #tpu.memory_space<vmem>>, vector<32x128xf32>
    %c0_3 = arith.constant 0 : index
    %c0_4 = arith.constant 0 : index
    %2 = vector.load %arg3[%c0_3, %c0_4] : memref<32x128xf32, #tpu.memory_space<vmem>>, vector<32x128xf32>
    %3 = arith.subf %1, %2 : vector<32x128xf32>
    %4 = arith.mulf %0, %3 : vector<32x128xf32>
    %cst = arith.constant dense<0.000000e+00> : vector<128xf32>
    %5 = vector.multi_reduction <add>, %4, %cst [0] : vector<32x128xf32> to vector<128xf32>
    %6 = vector.shape_cast %5 : vector<128xf32> to vector<1x128xf32>
    %cst_5 = arith.constant 0.000000e+00 : f32
    %7 = vector.broadcast %cst_5 : f32 to vector<1x128xf32>
    %8 = arith.minimumf %6, %7 : vector<1x128xf32>
    %9 = math.absf %6 : vector<1x128xf32>
    %cst_6 = arith.constant 0.000000e+00 : f32
    %10 = vector.broadcast %cst_6 : f32 to vector<1x128xf32>
    %11 = arith.subf %10, %9 : vector<1x128xf32>
    %12 = math.exp %11 : vector<1x128xf32>
    %cst_7 = arith.constant 1.000000e+00 : f32
    %13 = vector.broadcast %cst_7 : f32 to vector<1x128xf32>
    %14 = arith.addf %13, %12 : vector<1x128xf32>
    %15 = math.log %14 : vector<1x128xf32>
    %16 = arith.subf %8, %15 : vector<1x128xf32>
    %c0_i32 = arith.constant 0 : i32
    %17 = arith.cmpi slt, %arg0, %c0_i32 : i32
    %18 = arith.extui %17 : i1 to i32
    %c0_i32_8 = arith.constant 0 : i32
    %19 = arith.cmpi ne, %18, %c0_i32_8 : i32
    scf.if %19 {
      %23 = vector.shape_cast %16 : vector<1x128xf32> to vector<1x1x128xf32>
      %cst_11 = arith.constant dense<0.000000e+00> : vector<1xf32>
      %24 = vector.multi_reduction <add>, %23, %cst_11 [1, 2] : vector<1x1x128xf32> to vector<1xf32>
      %25 = vector.shape_cast %24 : vector<1xf32> to vector<1x1x1xf32>
      %26 = vector.extract %25[0, 0, 0] : f32 from vector<1x1x1xf32>
      %c0_12 = arith.constant 0 : index
      %c0_13 = arith.constant 0 : index
      %27 = memref.load %arg4[%c0_12, %c0_13] : memref<1x1xf32, #tpu.memory_space<smem>>
      memref.store %26, %arg4[%c0_12, %c0_13] : memref<1x1xf32, #tpu.memory_space<smem>>
    } else {
    }
    %c0_i32_9 = arith.constant 0 : i32
    %20 = arith.cmpi eq, %arg0, %c0_i32_9 : i32
    %21 = arith.extui %20 : i1 to i32
    %c0_i32_10 = arith.constant 0 : i32
    %22 = arith.cmpi ne, %21, %c0_i32_10 : i32
    scf.if %22 {
      %c128_i32 = arith.constant 128 : i32
      %23 = arith.muli %arg0, %c128_i32 : i32
      %24 = tpu.iota {dimensions = array<i32: 1>} : vector<1x128xi32>
      %25 = vector.broadcast %23 : i32 to vector<1x128xi32>
      %26 = arith.addi %25, %24 : vector<1x128xi32>
      %c8_i32 = arith.constant 8 : i32
      %27 = vector.broadcast %c8_i32 : i32 to vector<1x128xi32>
      %28 = arith.cmpi slt, %26, %27 : vector<1x128xi32>
      %cst_11 = arith.constant 0.000000e+00 : f32
      %29 = vector.broadcast %cst_11 : f32 to vector<1x128xf32>
      %30 = arith.select %28, %16, %29 : vector<1x128xi1>, vector<1x128xf32>
      %31 = vector.shape_cast %30 : vector<1x128xf32> to vector<1x1x128xf32>
      %cst_12 = arith.constant dense<0.000000e+00> : vector<1xf32>
      %32 = vector.multi_reduction <add>, %31, %cst_12 [1, 2] : vector<1x1x128xf32> to vector<1xf32>
      %33 = vector.shape_cast %32 : vector<1xf32> to vector<1x1x1xf32>
      %34 = vector.extract %33[0, 0, 0] : f32 from vector<1x1x1xf32>
      %c0_13 = arith.constant 0 : index
      %c0_14 = arith.constant 0 : index
      %35 = memref.load %arg4[%c0_13, %c0_14] : memref<1x1xf32, #tpu.memory_space<smem>>
      memref.store %34, %arg4[%c0_13, %c0_14] : memref<1x1xf32, #tpu.memory_space<smem>>
    } else {
    }
    return
  }
  func.func @transform_0(%arg0: i32) -> (i32, i32) {
    %c0_i32 = arith.constant 0 : i32
    %c0_i32_0 = arith.constant 0 : i32
    return %c0_i32, %arg0 : i32, i32
  }
  func.func @transform_1(%arg0: i32) -> (i32, i32) {
    %c0_i32 = arith.constant 0 : i32
    %c0_i32_0 = arith.constant 0 : i32
    return %c0_i32, %arg0 : i32, i32
  }
  func.func @transform_2(%arg0: i32) -> (i32, i32) {
    %c0_i32 = arith.constant 0 : i32
    %c0_i32_0 = arith.constant 0 : i32
    return %c0_i32, %arg0 : i32, i32
  }
  func.func @transform_3(%arg0: i32) -> (i32, i32) {
    %c0_i32 = arith.constant 0 : i32
    %c0_i32_0 = arith.constant 0 : i32
    return %arg0, %c0_i32 : i32, i32
  }
}

</mosaic_0001>

<bundles_post_ra>
// kernel: tpu_custom_call.1
= control target key start
LH: loop header
LB: loop body
LE: loop exit
PB: predicated region body
PF: predicated region fallthrough
CT: control target
= control target key end

     0   :  { %8 = vsyncpa [#allocation3], 0  ;;  %s334_s0 = inlined_call_operand.hbm [shape: f32[32,128], index: 0, kind: input, shape index: {}]   ;;  %s335_s1 = inlined_call_operand.hbm [shape: f32[32,128], index: 1, kind: input, shape index: {}]   ;;  %s336_s2 = inlined_call_operand.hbm [shape: f32[32,128], index: 2, kind: input, shape index: {}]   ;;  %s337_s3 = inlined_call_operand.hbm [shape: f32[1,1], index: 3, kind: output, shape index: {}]  }
   0x1   :  { %9 = vsyncpa [#allocation6], 0 }
   0x2   :  { %10 = vsyncpa [#allocation4], 0  ;;  %s244_s12 = smov [#allocation5]   ;;  %s245_s14 = smov [#allocation2]  }
   0x3   :  { %s28_s13 = sshll.u32 %s244_s12, 4  ;;  %s16_s15 = sshll.u32 %s245_s14, 4  ;;  %s29_s13 = int_to_ptr.vmem [resolvable:$true] %s28_s13  ;;  %s270_s15 = int_to_ptr.vmem [resolvable:$true] %s16_s15 }
   0x4   :  { %s162_s18 = scalar_lea.hbm %s335_s1, 512 }
   0x5   :  { %p163_p0 = scmp.ne.s32.totalorder %s335_s1, %s162_s18  ;;  %p166_p1 = scmp.lt.u32.totalorder %s162_s18, %s335_s1 }
   0x7   :  { %p168_p2 = pnand %p166_p1, %p163_p0 }
   0x9   :  { %171 = shalt.err (!%p168_p2)
}
   0xa   :  { %s172_s23 = scalar_lea.vmem %s29_s13, 512  ;;  %p177_p4 = scmp.lt.s32.totalorder %s29_s13, %s29_s13 }
   0xb   :  { %p173_p3 = scmp.ne.s32.totalorder %s29_s13, %s172_s23  ;;  %p178_p5 = scmp.lt.s32.totalorder %s172_s23, %s172_s23 }
   0xd   :  { %p179_p6 = por %p178_p5, %p177_p4 }
   0xf   :  { %p180_p7 = pnand %p179_p6, %p173_p3 }
  0x11   :  { %183 = shalt.err (!%p180_p7)
}
  0x12   :  { %s246_s24 = smov 128   ;;  %s247_s25 = smov 8  }
  0x13   :  { %34 = dma.hbm_to_vmem [thread:$0]  %s335_s1, 512, %s29_s13, [#allocation6], %s246_s24, %s246_s24, %s247_s25  }
  0x14   :  { %s184_s30 = scalar_lea.hbm %s334_s0, 512 }
  0x15   :  { %p185_p8 = scmp.ne.s32.totalorder %s334_s0, %s184_s30  ;;  %p188_p9 = scmp.lt.u32.totalorder %s184_s30, %s334_s0 }
  0x17   :  { %p190_p10 = pnand %p188_p9, %p185_p8 }
  0x19   :  { %193 = shalt.err (!%p190_p10)
}
  0x1a   :  { %s194_s8 = scalar_lea.vmem %s270_s15, 512  ;;  %p199_p12 = scmp.lt.s32.totalorder %s270_s15, %s270_s15 }
  0x1b   :  { %p195_p11 = scmp.ne.s32.totalorder %s270_s15, %s194_s8  ;;  %p200_p13 = scmp.lt.s32.totalorder %s194_s8, %s194_s8 }
  0x1d   :  { %p201_p0 = por %p200_p13, %p199_p12 }
  0x1f   :  { %p202_p1 = pnand %p201_p0, %p195_p11 }
  0x21   :  { %205 = shalt.err (!%p202_p1)
}
  0x22   :  { %22 = dma.hbm_to_vmem [thread:$0]  %s334_s0, 512, %s270_s15, [#allocation3], %s246_s24, %s246_s24, %s247_s25  }
  0x23   :  { %s248_s10 = smov [#allocation7]   ;;  %s206_s14 = scalar_lea.hbm %s336_s2, 512 }
  0x24   :  { %s40_s11 = sshll.u32 %s248_s10, 4  ;;  %p207_p2 = scmp.ne.s32.totalorder %s336_s2, %s206_s14  ;;  %s41_s11 = int_to_ptr.vmem [resolvable:$true] %s40_s11 }
  0x25   :  { %p210_p3 = scmp.lt.u32.totalorder %s206_s14, %s336_s2 }
  0x27   :  { %p212_p4 = pnand %p210_p3, %p207_p2 }
  0x29   :  { %215 = shalt.err (!%p212_p4)
}
  0x2a   :  { %s216_s20 = scalar_lea.vmem %s41_s11, 512  ;;  %p221_p6 = scmp.lt.s32.totalorder %s41_s11, %s41_s11 }
  0x2b   :  { %p217_p5 = scmp.ne.s32.totalorder %s41_s11, %s216_s20  ;;  %p222_p7 = scmp.lt.s32.totalorder %s216_s20, %s216_s20 }
  0x2d   :  { %p223_p8 = por %p222_p7, %p221_p6 }
  0x2f   :  { %p224_p9 = pnand %p223_p8, %p217_p5 }
  0x31   :  { %227 = shalt.err (!%p224_p9)
}
  0x32   :  { %46 = dma.hbm_to_vmem [thread:$0]  %s336_s2, 512, %s41_s11, [#allocation6], %s246_s24, %s246_s24, %s247_s25  }
  0x33   :  { %238 = dma.done.wait [#allocation3], 512  }
  0x34   :  { %239 = vsyncadd [#allocation3], 4294966784 }
  0x35   :  { %240 = dma.done.wait [#allocation6], 1024  }
  0x36   :  { %241 = vsyncadd [#allocation6], 4294966272  ;;  %v56_v0 = vld [vmem:[#allocation2] sm:$0xff]  ;;  %v57_v1 = vld [vmem:[#allocation2 + $0x8] sm:$0xff]  ;;  %v116_v34 = vlaneseq  ;;  %vm122_vm1 = vcmask 1040384   ;;  %s228_s23 = scalar_lea.hbm %s337_s3, 16 }
  0x37   :  { %v58_v2 = vld [vmem:[#allocation2 + $0x10] sm:$0xff]  ;;  %v60_v3 = vld [vmem:[#allocation5] sm:$0xff]  ;;  %v61_v4 = vld [vmem:[#allocation5 + $0x8] sm:$0xff]  ;;  %p229_p10 = scmp.ne.s32.totalorder %s337_s3, %s228_s23  ;;  %p232_p11 = scmp.lt.u32.totalorder %s228_s23, %s337_s3 }
  0x38   :  { %v62_v5 = vld [vmem:[#allocation5 + $0x10] sm:$0xff]  ;;  %v63_v6 = vld [vmem:[#allocation5 + $0x18] sm:$0xff]  ;;  %v64_v7 = vld [vmem:[#allocation7] sm:$0xff]  ;;  %v117_v35 = vand.u32 127, %v116_v34 }
  0x39   :  { %v65_v8 = vld [vmem:[#allocation7 + $0x8] sm:$0xff]  ;;  %v66_v9 = vld [vmem:[#allocation7 + $0x10] sm:$0xff]  ;;  %v67_v10 = vld [vmem:[#allocation7 + $0x18] sm:$0xff]  ;;  %v68_v11 = vsub.f32 %v60_v3, %v64_v7  ;;  %p234_p12 = pnand %p232_p11, %p229_p10 }
  0x3a   :  { %v69_v12 = vsub.f32 %v61_v4, %v65_v8  ;;  %v70_v13 = vsub.f32 %v62_v5, %v66_v9  ;;  %v71_v14 = vsub.f32 %v63_v6, %v67_v10  ;;  %v59_v15 = vld [vmem:[#allocation2 + $0x18] sm:$0xff]  ;;  %vm120_vm0 = vcmp.lt.s32.totalorder %v117_v35, 8 }
  0x3b   :  { %v72_v16 = vmul.f32 %v68_v11, %v56_v0 }
  0x3c   :  { %v73_v17 = vmul.f32 %v69_v12, %v57_v1  ;;  %v74_v18 = vmul.f32 %v70_v13, %v58_v2  ;;  %v75_v19 = vmul.f32 %v71_v14, %v59_v15 }
  0x3e   :  { %v76_v20 = vadd.f32 %v73_v17, %v72_v16 }
  0x40   :  { %v77_v21 = vadd.f32 %v76_v20, %v74_v18 }
  0x42   :  { %v78_v22 = vadd.f32 %v77_v21, %v75_v19 }
  0x44   :  { %v79_v23 = vrot.slane %v78_v22, 4 }
  0x46   :  { %v80_v24 = vadd.f32 %v79_v23, %v78_v22 }
  0x48   :  { %v81_v25 = vrot.slane %v80_v24, 2 }
  0x4a   :  { %v82_v26 = vadd.f32 %v81_v25, %v80_v24 }
  0x4c   :  { %v83_v27 = vrot.slane %v82_v26, 1 }
  0x4e   :  { %v84_v28 = vadd.f32 %v83_v27, %v82_v26 }
  0x50   :  { %v86_v29 = vand.u32 2147483647, %v84_v28  ;;  %v85_v36 = vmin.f32 %v84_v28, 0.0 }
  0x52   :  { %v87_v30 = vsub.f32 0.0, %v86_v29 }
  0x54   :  { %v88_v31 = vmul.f32 1.442695, %v87_v30 }
  0x56   :  { %158 = vpow2.f32 %v88_v31 }
  0x60   :  { %v159_v32 = vpop.eup %158 }
  0x61   :  { %v90_v33 = vadd.f32 1.0, %v159_v32 }
  0x63   :  { %160 = vlog2.f32 %v90_v33 }
  0x6d   :  { %v161_v37 = vpop.eup %160 }
  0x6e   :  { %v92_v38 = vmul.f32 0.6931472, %v161_v37 }
  0x70   :  { %v93_v39 = vsub.f32 %v85_v36, %v92_v38 }
  0x72   :  { %v121_v40 = vsel %vm120_vm0, %v93_v39, 0.0 }
  0x73   :  { %v123_v41 = vsel %vm122_vm1, %v121_v40, 0.0 }
  0x74   :  { %124 = vadd.xlane.f32.xlu0 %v123_v41 }
 0x101   :  { %v125_v42 = vpop.xlane.xlu0 %124 }
 0x102   :  { %v126_v43 = vrot.slane %v125_v42, 4 }
 0x104   :  { %v127_v44 = vadd.f32 %v126_v43, %v125_v42 }
 0x106   :  { %v128_v45 = vrot.slane %v127_v44, 2 }
 0x108   :  { %v129_v46 = vadd.f32 %v128_v45, %v127_v44 }
 0x10a   :  { %v130_v47 = vrot.slane %v129_v46, 1 }
 0x10c   :  { %v131_v48 = vadd.f32 %v130_v47, %v129_v46 }
 0x10e   :  { %150 = vpush %v131_v48 }
 0x13f   :  { %s151_s2 = spop %150 }
 0x140   :  { %134 = sst [smem:[#allocation8]] %s151_s2 }
 0x141   :  { %237 = shalt.err (!%p234_p12)
}
 0x142   :  { %s249_s28 = smov [#allocation8]  }
 0x143   :  { %142 = dma.smem_to_hbm %s249_s28, 16, %s337_s3, [#allocation4]  }
 0x144   :  { %242 = dma.done.wait [#allocation4], 16  }
 0x145   :  { %243 = vsyncadd [#allocation4], 4294967280 }
 0x146   :  { %146 = sfence }
 0x147   :  { %147 = vsyncpa [#allocation3], 1 }
 0x148   :  { %148 = vsyncpa [#allocation6], 1 }
 0x149   :  { %149 = vsyncpa [#allocation4], 1 }

</bundles_post_ra>
